<compile_context>
chip_gen: v6e
topology: v6e:2x2x1
jax: 0.10.0
libtpu: 0.0.40
codegen_flags: <defaults>
</compile_context>

<pallas_src>
import functools
import math

import jax
import jax.numpy as jnp
import numpy as np
from jax import lax
from jax.experimental import pallas as pl
from jax.experimental.pallas import tpu as pltpu


def _round_down(v, m):
    return (v // m) * m


def _round_up(v, m):
    return -(-v // m) * m


def _const_block_spec(shape, index_map):
    """BlockSpec for grid-invariant operands; single-buffered when supported."""
    try:
        return pl.BlockSpec(shape, index_map, pipeline_mode=pl.Buffered(1))
    except TypeError:  # older JAX without pipeline_mode: fall back to default
        return pl.BlockSpec(shape, index_map)


# ---------------------------------------------------------------------------
# Pallas kernel: one grid step == Tt LSTM time steps (sequential grid axis).
# gates_x / hseq are sublane-packed: rows are (time-within-group, batch).
# Gate column order inside the kernel is [i | f | o | g].
# ---------------------------------------------------------------------------
def lstm_recurrent_kernel(*refs, H, B, G, steps, seq_len, masked, has_hidden,
                          unroll):
    it = iter(refs)
    gx_ref = next(it)                      # (steps, G*B, 4H)
    if has_hidden:
        h0_ref, c0_ref = next(it), next(it)   # (B, H) each
    whh_ref = next(it)                     # (H, 4H), cols reordered [i|f|o|g]
    hseq_ref = next(it)                    # (steps, G*B, H)
    hN_ref = next(it)                      # (B, H) resident carry / output
    cN_ref = next(it)                      # (B, H) resident carry / output

    blk = pl.program_id(0)
    Tt = steps * G

    # Initialize the resident carry blocks on the first time-block.
    @pl.when(blk == 0)
    def _():
        if has_hidden:
            hN_ref[...] = h0_ref[...].astype(jnp.float32)
            cN_ref[...] = c0_ref[...].astype(jnp.float32)
        else:
            hN_ref[...] = jnp.zeros_like(hN_ref)
            cN_ref[...] = jnp.zeros_like(cN_ref)

    whh = whh_ref[...]                     # hoisted out of the loop

    def outer(q, carry):
        h, c = carry
        gx_q = gx_ref[q].astype(jnp.float32)   # one dense (G*B, 4H) group load
        rows = []
        for j in range(G):                      # static: static sublane slices
            gates = gx_q[j * B:(j + 1) * B, :] + jnp.dot(
                h.astype(whh.dtype), whh, preferred_element_type=jnp.float32)
            # sigmoid(x) == 0.5*tanh(0.5*x)+0.5 : 1 EUP op/elem, covers [i|f|o]
            act = 0.5 * jnp.tanh(0.5 * gates[:, :3 * H]) + 0.5
            g_g = jnp.tanh(gates[:, 3 * H:])
            i_g = act[:, :H]
            f_g = act[:, H:2 * H]
            o_g = act[:, 2 * H:]
            c_new = f_g * c + i_g * g_g
            h_new = o_g * jnp.tanh(c_new)
            rows.append(h_new)                  # padded rows sliced off later
            if masked:
                # Padding can only exist in the final block; freeze the carry
                # on padded steps so hN/cN stay at the last valid state.
                valid = (blk * Tt + q * G + j) < seq_len
                h_new = jnp.where(valid, h_new, h)
                c_new = jnp.where(valid, c_new, c)
            h, c = h_new, c_new
        # One dense (G*B, H) store per group instead of G masked (B, H) stores.
        hseq_ref[q] = jnp.concatenate(rows, axis=0) if G > 1 else rows[0]
        return h, c

    h, c = lax.fori_loop(0, steps, outer, (hN_ref[...], cN_ref[...]),
                         unroll=unroll)
    hN_ref[...] = h
    cN_ref[...] = c


# ---------------------------------------------------------------------------
# Wrapper
# ---------------------------------------------------------------------------
@functools.partial(jax.jit, static_argnames=("time_block", "use_bf16"))
def char_lstm_generator(x, params, hidden=None, *, time_block=None,
                        use_bf16=False):
    """x: (B, T, D) float32.  Returns (out (B,T,O), (h_n, c_n) each (1,B,H))."""
    B, T, D = x.shape
    w_ih, w_hh, b_ih, b_hh, w_fc, b_fc = (
        params["w_ih"], params["w_hh"], params["b_ih"],
        params["b_hh"], params["w_fc"], params["b_fc"],
    )
    H = w_hh.shape[1]
    O = w_fc.shape[0]
    has_hidden = hidden is not None

    # --- reorder gate rows from PyTorch [i, f, g, o] to [i, f, o, g] ---------
    perm = np.concatenate([np.arange(0, 2 * H), np.arange(3 * H, 4 * H),
                           np.arange(2 * H, 3 * H)])
    w_ih_r = w_ih[perm].astype(jnp.float32)            # (4H, D)
    w_hh_r = w_hh[perm].astype(jnp.float32)            # (4H, H)
    bias_r = (b_ih + b_hh)[perm].astype(jnp.float32)   # (4H,)

    # bf16 fast path is opt-in (would exceed the 1e-4 reference tolerance).
    compute_dtype = jnp.bfloat16 if use_bf16 else jnp.float32
    itemsize = 2 if use_bf16 else 4
    whhT = w_hh_r.T.astype(compute_dtype)              # (H, 4H)

    # --- hoist the input projection: one big MXU-friendly matmul ------------
    x_tbd = jnp.transpose(x, (1, 0, 2)).astype(jnp.float32)       # (T, B, D)
    gx = (x_tbd.reshape(T * B, D) @ w_ih_r.T + bias_r)            # (T*B, 4H)
    gx = gx.astype(compute_dtype)

    # --- sublane grouping & time-block sizing --------------------------------
    G = 8 // math.gcd(B, 8)                 # time steps per dense sublane group

    try:
        info = pltpu.get_tpu_info()
        vmem_cap = int(getattr(info, "vmem_capacity_bytes", 64 * 1024 * 1024))
    except Exception:
        vmem_cap = 64 * 1024 * 1024          # conservative (v7x-safe) fallback
    usable = max(vmem_cap - 12 * 1024 * 1024, 8 * 1024 * 1024)

    # Bytes per time step in the streamed (double-buffered) blocks.
    per_step_bytes = B * (2 * 4 * H * itemsize + 2 * H * 4)
    fixed_bytes = 2 * H * 4 * H * itemsize + 8 * B * H * 4
    max_tt = max(1, (usable - fixed_bytes) // per_step_bytes)

    tt_cap = int(time_block) if time_block else 512
    tt_raw = max(1, min(T, max_tt, tt_cap))
    if tt_raw >= T:
        Tt = _round_up(T, G)                 # single block
    else:
        Tt = max(G, _round_down(tt_raw, G))
    nblk = -(-T // Tt)
    Tp = nblk * Tt
    masked = (Tp != T)
    steps = Tt // G
    unroll = True if Tt <= 64 else max(1, 8 // G)

    # --- pack gates_x sublane-dense: (Tp*B, 4H) -> (Tp/G, G*B, 4H) (free) ----
    if masked:
        gx = jnp.pad(gx, ((0, (Tp - T) * B), (0, 0)))
    gx = gx.reshape(Tp // G, G * B, 4 * H)

    # --- specs ----------------------------------------------------------------
    in_specs = [pl.BlockSpec((steps, G * B, 4 * H), lambda b: (b, 0, 0))]
    inputs = [gx]
    if has_hidden:
        h0 = jnp.asarray(hidden[0], jnp.float32).reshape(B, H)
        c0 = jnp.asarray(hidden[1], jnp.float32).reshape(B, H)
        in_specs += [_const_block_spec((B, H), lambda b: (0, 0)),
                     _const_block_spec((B, H), lambda b: (0, 0))]
        inputs += [h0, c0]
    in_specs.append(_const_block_spec((H, 4 * H), lambda b: (0, 0)))
    inputs.append(whhT)

    out_specs = [
        pl.BlockSpec((steps, G * B, H), lambda b: (b, 0, 0)),   # hidden seq
        pl.BlockSpec((B, H), lambda b: (0, 0)),                 # h_n (resident)
        pl.BlockSpec((B, H), lambda b: (0, 0)),                 # c_n (resident)
    ]

    grid_spec = pltpu.PrefetchScalarGridSpec(
        num_scalar_prefetch=0,
        grid=(nblk,),
        in_specs=in_specs,
        out_specs=out_specs,
    )

    vmem_need = (2 * Tt * B * 4 * H * itemsize   # gx block, double-buffered
                 + 2 * Tt * B * H * 4            # hseq block, double-buffered
                 + 2 * H * 4 * H * itemsize      # W_hh^T (budget 2 bufs)
                 + 8 * B * H * 4)                # h0/c0/hN/cN
    vmem_limit = int(min(usable, max(vmem_need + (2 << 20), 8 * 1024 * 1024)))

    cost = pl.CostEstimate(
        flops=2 * Tp * B * H * 4 * H + 10 * Tp * B * H,
        transcendentals=5 * Tp * B * H,
        bytes_accessed=(Tp * B * 4 * H * itemsize + Tp * B * H * 4
                        + H * 4 * H * itemsize + 4 * B * H * 4),
    )

    hseq, h_n, c_n = pl.pallas_call(
        functools.partial(lstm_recurrent_kernel, H=H, B=B, G=G, steps=steps,
                          seq_len=T, masked=masked, has_hidden=has_hidden,
                          unroll=unroll),
        out_shape=(
            jax.ShapeDtypeStruct((Tp // G, G * B, H), jnp.float32),
            jax.ShapeDtypeStruct((B, H), jnp.float32),
            jax.ShapeDtypeStruct((B, H), jnp.float32),
        ),
        grid_spec=grid_spec,
        compiler_params=pltpu.CompilerParams(
            dimension_semantics=("arbitrary",),     # time blocks are sequential
            vmem_limit_bytes=vmem_limit,
        ),
        cost_estimate=cost,
    )(*inputs)

    # --- unpack + hoisted FC: single (B*T, H) x (H, O) matmul ---------------
    hseq_bth = jnp.transpose(hseq.reshape(Tp, B, H)[:T], (1, 0, 2))   # (B,T,H)
    out = (hseq_bth.reshape(B * T, H) @ w_fc.T.astype(jnp.float32)
           + b_fc.astype(jnp.float32)).reshape(B, T, O)

    return out, (h_n[None], c_n[None])


# ---------------------------------------------------------------------------
# Pure-JAX reference (mirrors torch.nn.LSTM + nn.Linear semantics)
# ---------------------------------------------------------------------------
def reference_forward(x, params, hidden=None):
    w_ih, w_hh, b_ih, b_hh, w_fc, b_fc = (
        params["w_ih"], params["w_hh"], params["b_ih"],
        params["b_hh"], params["w_fc"], params["b_fc"],
    )
    B, T, D = x.shape
    H = w_hh.shape[1]
    if hidden is None:
        h = jnp.zeros((B, H), jnp.float32)
        c = jnp.zeros((B, H), jnp.float32)
    else:
        h, c = hidden[0][0], hidden[1][0]

    def step(carry, x_t):
        h, c = carry
        gates = x_t @ w_ih.T + h @ w_hh.T + b_ih + b_hh
        i = jax.nn.sigmoid(gates[:, 0 * H:1 * H])
        f = jax.nn.sigmoid(gates[:, 1 * H:2 * H])
        g = jnp.tanh(gates[:, 2 * H:3 * H])
        o = jax.nn.sigmoid(gates[:, 3 * H:4 * H])
        c_new = f * c + i * g
        h_new = o * jnp.tanh(c_new)
        return (h_new, c_new), h_new

    (h_n, c_n), hs = lax.scan(step, (h, c), jnp.transpose(x, (1, 0, 2)))
    out = jnp.transpose(hs, (1, 0, 2)) @ w_fc.T + b_fc
    return out, (h_n[None], c_n[None])


# ---------------------------------------------------------------------------
# Deterministic parameter init (PyTorch-style uniform(-1/sqrt(H), 1/sqrt(H)))
# ---------------------------------------------------------------------------
def init_params(key, input_dim, hidden_dim, output_dim):
    ks = jax.random.split(key, 6)
    bound = 1.0 / np.sqrt(hidden_dim)
    u = lambda k, shape: jax.random.uniform(
        k, shape, jnp.float32, minval=-bound, maxval=bound)
    return {
        "w_ih": u(ks[0], (4 * hidden_dim, input_dim)),   # gate order: i, f, g, o
        "w_hh": u(ks[1], (4 * hidden_dim, hidden_dim)),
        "b_ih": u(ks[2], (4 * hidden_dim,)),
        "b_hh": u(ks[3], (4 * hidden_dim,)),
        "w_fc": u(ks[4], (output_dim, hidden_dim)),
        "b_fc": u(ks[5], (output_dim,)),
    }


if __name__ == "__main__":
    B, T = 2, 8
    input_dim, hidden_dim, output_dim = 16, 32, 16

    key = jax.random.PRNGKey(0)
    k_x, k_p = jax.random.split(key)
    x = jax.random.normal(k_x, (B, T, input_dim), jnp.float32)
    params = init_params(k_p, input_dim, hidden_dim, output_dim)

    out, (h_n, c_n) = char_lstm_generator(x, params, hidden=None)
    jax.block_until_ready((out, h_n, c_n))

    ref_out, (ref_h, ref_c) = reference_forward(x, params, hidden=None)
    np.testing.assert_allclose(np.asarray(out), np.asarray(ref_out),
                               rtol=1e-4, atol=1e-5)
    np.testing.assert_allclose(np.asarray(h_n), np.asarray(ref_h),
                               rtol=1e-4, atol=1e-5)
    np.testing.assert_allclose(np.asarray(c_n), np.asarray(ref_c),
                               rtol=1e-4, atol=1e-5)

    assert out.shape == (B, T, output_dim)
    assert h_n.shape == (1, B, hidden_dim) and c_n.shape == (1, B, hidden_dim)
    print("KERNEL_OK")
</pallas_src>

<mosaic_0001>
module attributes {stable_mosaic.version = 11 : i64} {
  func.func @lstm_recurrent_kernel(%arg0: i32, %arg1: memref<2x8x128xf32, #tpu.memory_space<vmem>>, %arg2: memref<32x128xf32, #tpu.memory_space<vmem>>, %arg3: memref<2x8x32xf32, #tpu.memory_space<vmem>>, %arg4: memref<2x32xf32, #tpu.memory_space<vmem>>, %arg5: memref<2x32xf32, #tpu.memory_space<vmem>>) attributes {dimension_semantics = [#tpu.dimension_semantics<arbitrary>], iteration_bounds = array<i64: 1>, scalar_prefetch = 0 : i64, scratch_operands = 0 : i64, tpu.core_type = #tpu.core_type<tc>, window_params = [{transform_indices = @transform_0, window_bounds = array<i64: 2, 8, 128>}, {pipeline_mode = #tpu.pipeline_mode<synchronous>, transform_indices = @transform_1, window_bounds = array<i64: 32, 128>}, {transform_indices = @transform_2, window_bounds = array<i64: 2, 8, 32>}, {pipeline_mode = #tpu.pipeline_mode<synchronous>, transform_indices = @transform_3, window_bounds = array<i64: 2, 32>}, {pipeline_mode = #tpu.pipeline_mode<synchronous>, transform_indices = @transform_4, window_bounds = array<i64: 2, 32>}]} {
    %c0_i32 = arith.constant 0 : i32
    %0 = arith.cmpi eq, %arg0, %c0_i32 : i32
    %1 = arith.extui %0 : i1 to i32
    %c0_i32_0 = arith.constant 0 : i32
    %2 = arith.cmpi ne, %1, %c0_i32_0 : i32
    scf.if %2 {
      %cst_50 = arith.constant 0.000000e+00 : f32
      %192 = vector.broadcast %cst_50 : f32 to vector<2x32xf32>
      %c0_51 = arith.constant 0 : index
      %c0_52 = arith.constant 0 : index
      %193 = vector.load %arg4[%c0_51, %c0_52] : memref<2x32xf32, #tpu.memory_space<vmem>>, vector<2x32xf32>
      tpu.vector_store %arg4[%c0_51, %c0_52], %192 {strides = array<i32>} : memref<2x32xf32, #tpu.memory_space<vmem>>, vector<2x32xf32>,
      %cst_53 = arith.constant 0.000000e+00 : f32
      %194 = vector.broadcast %cst_53 : f32 to vector<2x32xf32>
      %c0_54 = arith.constant 0 : index
      %c0_55 = arith.constant 0 : index
      %195 = vector.load %arg5[%c0_54, %c0_55] : memref<2x32xf32, #tpu.memory_space<vmem>>, vector<2x32xf32>
      tpu.vector_store %arg5[%c0_54, %c0_55], %194 {strides = array<i32>} : memref<2x32xf32, #tpu.memory_space<vmem>>, vector<2x32xf32>,
    } else {
    }
    %c0 = arith.constant 0 : index
    %c0_1 = arith.constant 0 : index
    %3 = vector.load %arg2[%c0, %c0_1] : memref<32x128xf32, #tpu.memory_space<vmem>>, vector<32x128xf32>
    %c0_2 = arith.constant 0 : index
    %c0_3 = arith.constant 0 : index
    %4 = vector.load %arg4[%c0_2, %c0_3] : memref<2x32xf32, #tpu.memory_space<vmem>>, vector<2x32xf32>
    %c0_4 = arith.constant 0 : index
    %c0_5 = arith.constant 0 : index
    %5 = vector.load %arg5[%c0_4, %c0_5] : memref<2x32xf32, #tpu.memory_space<vmem>>, vector<2x32xf32>
    %c0_i32_6 = arith.constant 0 : i32
    %6 = arith.index_cast %c0_i32_6 : i32 to index
    %c0_7 = arith.constant 0 : index
    %c0_8 = arith.constant 0 : index
    %7 = vector.load %arg1[%6, %c0_7, %c0_8] : memref<2x8x128xf32, #tpu.memory_space<vmem>>, vector<1x8x128xf32>
    %8 = vector.shape_cast %7 : vector<1x8x128xf32> to vector<8x128xf32>
    %9 = vector.extract_strided_slice %8 {offsets = [0, 0], sizes = [2, 128], strides = [1, 1]} : vector<8x128xf32> to vector<2x128xf32>
    %cst = arith.constant dense<0.000000e+00> : vector<2x128xf32>
    %10 = tpu.matmul %4, %3, %cst {dimension_numbers = #tpu.dot_dimension_numbers<[1], [0], [0], [1], [0, 0, 1, 1], [], []>} : vector<2x32xf32>, vector<32x128xf32>, vector<2x128xf32> -> vector<2x128xf32>
    %11 = arith.addf %9, %10 : vector<2x128xf32>
    %12 = vector.extract_strided_slice %11 {offsets = [0, 0], sizes = [2, 96], strides = [1, 1]} : vector<2x128xf32> to vector<2x96xf32>
    %cst_9 = arith.constant 5.000000e-01 : f32
    %13 = vector.broadcast %cst_9 : f32 to vector<2x96xf32>
    %14 = arith.mulf %13, %12 : vector<2x96xf32>
    %15 = math.tanh %14 : vector<2x96xf32>
    %cst_10 = arith.constant 5.000000e-01 : f32
    %16 = vector.broadcast %cst_10 : f32 to vector<2x96xf32>
    %17 = arith.mulf %16, %15 : vector<2x96xf32>
    %cst_11 = arith.constant 5.000000e-01 : f32
    %18 = vector.broadcast %cst_11 : f32 to vector<2x96xf32>
    %19 = arith.addf %17, %18 : vector<2x96xf32>
    %20 = vector.extract_strided_slice %11 {offsets = [0, 96], sizes = [2, 32], strides = [1, 1]} : vector<2x128xf32> to vector<2x32xf32>
    %21 = math.tanh %20 : vector<2x32xf32>
    %22 = vector.extract_strided_slice %19 {offsets = [0, 0], sizes = [2, 32], strides = [1, 1]} : vector<2x96xf32> to vector<2x32xf32>
    %23 = vector.extract_strided_slice %19 {offsets = [0, 32], sizes = [2, 32], strides = [1, 1]} : vector<2x96xf32> to vector<2x32xf32>
    %24 = vector.extract_strided_slice %19 {offsets = [0, 64], sizes = [2, 32], strides = [1, 1]} : vector<2x96xf32> to vector<2x32xf32>
    %25 = arith.mulf %23, %5 : vector<2x32xf32>
    %26 = arith.mulf %22, %21 : vector<2x32xf32>
    %27 = arith.addf %25, %26 : vector<2x32xf32>
    %28 = math.tanh %27 : vector<2x32xf32>
    %29 = arith.mulf %24, %28 : vector<2x32xf32>
    %30 = vector.extract_strided_slice %8 {offsets = [2, 0], sizes = [2, 128], strides = [1, 1]} : vector<8x128xf32> to vector<2x128xf32>
    %cst_12 = arith.constant dense<0.000000e+00> : vector<2x128xf32>
    %31 = tpu.matmul %29, %3, %cst_12 {dimension_numbers = #tpu.dot_dimension_numbers<[1], [0], [0], [1], [0, 0, 1, 1], [], []>} : vector<2x32xf32>, vector<32x128xf32>, vector<2x128xf32> -> vector<2x128xf32>
    %32 = arith.addf %30, %31 : vector<2x128xf32>
    %33 = vector.extract_strided_slice %32 {offsets = [0, 0], sizes = [2, 96], strides = [1, 1]} : vector<2x128xf32> to vector<2x96xf32>
    %cst_13 = arith.constant 5.000000e-01 : f32
    %34 = vector.broadcast %cst_13 : f32 to vector<2x96xf32>
    %35 = arith.mulf %34, %33 : vector<2x96xf32>
    %36 = math.tanh %35 : vector<2x96xf32>
    %cst_14 = arith.constant 5.000000e-01 : f32
    %37 = vector.broadcast %cst_14 : f32 to vector<2x96xf32>
    %38 = arith.mulf %37, %36 : vector<2x96xf32>
    %cst_15 = arith.constant 5.000000e-01 : f32
    %39 = vector.broadcast %cst_15 : f32 to vector<2x96xf32>
    %40 = arith.addf %38, %39 : vector<2x96xf32>
    %41 = vector.extract_strided_slice %32 {offsets = [0, 96], sizes = [2, 32], strides = [1, 1]} : vector<2x128xf32> to vector<2x32xf32>
    %42 = math.tanh %41 : vector<2x32xf32>
    %43 = vector.extract_strided_slice %40 {offsets = [0, 0], sizes = [2, 32], strides = [1, 1]} : vector<2x96xf32> to vector<2x32xf32>
    %44 = vector.extract_strided_slice %40 {offsets = [0, 32], sizes = [2, 32], strides = [1, 1]} : vector<2x96xf32> to vector<2x32xf32>
    %45 = vector.extract_strided_slice %40 {offsets = [0, 64], sizes = [2, 32], strides = [1, 1]} : vector<2x96xf32> to vector<2x32xf32>
    %46 = arith.mulf %44, %27 : vector<2x32xf32>
    %47 = arith.mulf %43, %42 : vector<2x32xf32>
    %48 = arith.addf %46, %47 : vector<2x32xf32>
    %49 = math.tanh %48 : vector<2x32xf32>
    %50 = arith.mulf %45, %49 : vector<2x32xf32>
    %51 = vector.extract_strided_slice %8 {offsets = [4, 0], sizes = [2, 128], strides = [1, 1]} : vector<8x128xf32> to vector<2x128xf32>
    %cst_16 = arith.constant dense<0.000000e+00> : vector<2x128xf32>
    %52 = tpu.matmul %50, %3, %cst_16 {dimension_numbers = #tpu.dot_dimension_numbers<[1], [0], [0], [1], [0, 0, 1, 1], [], []>} : vector<2x32xf32>, vector<32x128xf32>, vector<2x128xf32> -> vector<2x128xf32>
    %53 = arith.addf %51, %52 : vector<2x128xf32>
    %54 = vector.extract_strided_slice %53 {offsets = [0, 0], sizes = [2, 96], strides = [1, 1]} : vector<2x128xf32> to vector<2x96xf32>
    %cst_17 = arith.constant 5.000000e-01 : f32
    %55 = vector.broadcast %cst_17 : f32 to vector<2x96xf32>
    %56 = arith.mulf %55, %54 : vector<2x96xf32>
    %57 = math.tanh %56 : vector<2x96xf32>
    %cst_18 = arith.constant 5.000000e-01 : f32
    %58 = vector.broadcast %cst_18 : f32 to vector<2x96xf32>
    %59 = arith.mulf %58, %57 : vector<2x96xf32>
    %cst_19 = arith.constant 5.000000e-01 : f32
    %60 = vector.broadcast %cst_19 : f32 to vector<2x96xf32>
    %61 = arith.addf %59, %60 : vector<2x96xf32>
    %62 = vector.extract_strided_slice %53 {offsets = [0, 96], sizes = [2, 32], strides = [1, 1]} : vector<2x128xf32> to vector<2x32xf32>
    %63 = math.tanh %62 : vector<2x32xf32>
    %64 = vector.extract_strided_slice %61 {offsets = [0, 0], sizes = [2, 32], strides = [1, 1]} : vector<2x96xf32> to vector<2x32xf32>
    %65 = vector.extract_strided_slice %61 {offsets = [0, 32], sizes = [2, 32], strides = [1, 1]} : vector<2x96xf32> to vector<2x32xf32>
    %66 = vector.extract_strided_slice %61 {offsets = [0, 64], sizes = [2, 32], strides = [1, 1]} : vector<2x96xf32> to vector<2x32xf32>
    %67 = arith.mulf %65, %48 : vector<2x32xf32>
    %68 = arith.mulf %64, %63 : vector<2x32xf32>
    %69 = arith.addf %67, %68 : vector<2x32xf32>
    %70 = math.tanh %69 : vector<2x32xf32>
    %71 = arith.mulf %66, %70 : vector<2x32xf32>
    %72 = vector.extract_strided_slice %8 {offsets = [6, 0], sizes = [2, 128], strides = [1, 1]} : vector<8x128xf32> to vector<2x128xf32>
    %cst_20 = arith.constant dense<0.000000e+00> : vector<2x128xf32>
    %73 = tpu.matmul %71, %3, %cst_20 {dimension_numbers = #tpu.dot_dimension_numbers<[1], [0], [0], [1], [0, 0, 1, 1], [], []>} : vector<2x32xf32>, vector<32x128xf32>, vector<2x128xf32> -> vector<2x128xf32>
    %74 = arith.addf %72, %73 : vector<2x128xf32>
    %75 = vector.extract_strided_slice %74 {offsets = [0, 0], sizes = [2, 96], strides = [1, 1]} : vector<2x128xf32> to vector<2x96xf32>
    %cst_21 = arith.constant 5.000000e-01 : f32
    %76 = vector.broadcast %cst_21 : f32 to vector<2x96xf32>
    %77 = arith.mulf %76, %75 : vector<2x96xf32>
    %78 = math.tanh %77 : vector<2x96xf32>
    %cst_22 = arith.constant 5.000000e-01 : f32
    %79 = vector.broadcast %cst_22 : f32 to vector<2x96xf32>
    %80 = arith.mulf %79, %78 : vector<2x96xf32>
    %cst_23 = arith.constant 5.000000e-01 : f32
    %81 = vector.broadcast %cst_23 : f32 to vector<2x96xf32>
    %82 = arith.addf %80, %81 : vector<2x96xf32>
    %83 = vector.extract_strided_slice %74 {offsets = [0, 96], sizes = [2, 32], strides = [1, 1]} : vector<2x128xf32> to vector<2x32xf32>
    %84 = math.tanh %83 : vector<2x32xf32>
    %85 = vector.extract_strided_slice %82 {offsets = [0, 0], sizes = [2, 32], strides = [1, 1]} : vector<2x96xf32> to vector<2x32xf32>
    %86 = vector.extract_strided_slice %82 {offsets = [0, 32], sizes = [2, 32], strides = [1, 1]} : vector<2x96xf32> to vector<2x32xf32>
    %87 = vector.extract_strided_slice %82 {offsets = [0, 64], sizes = [2, 32], strides = [1, 1]} : vector<2x96xf32> to vector<2x32xf32>
    %88 = arith.mulf %86, %69 : vector<2x32xf32>
    %89 = arith.mulf %85, %84 : vector<2x32xf32>
    %90 = arith.addf %88, %89 : vector<2x32xf32>
    %91 = math.tanh %90 : vector<2x32xf32>
    %92 = arith.mulf %87, %91 : vector<2x32xf32>
    %93 = tpu.concatenate %29, %50, %71, %92 in 0 : vector<2x32xf32>, vector<2x32xf32>, vector<2x32xf32>, vector<2x32xf32> -> vector<8x32xf32>
    %94 = arith.index_cast %c0_i32_6 : i32 to index
    %c0_24 = arith.constant 0 : index
    %c0_25 = arith.constant 0 : index
    %95 = vector.load %arg3[%94, %c0_24, %c0_25] : memref<2x8x32xf32, #tpu.memory_space<vmem>>, vector<1x8x32xf32>
    %96 = vector.shape_cast %95 : vector<1x8x32xf32> to vector<8x32xf32>
    %97 = vector.shape_cast %93 : vector<8x32xf32> to vector<1x8x32xf32>
    tpu.vector_store %arg3[%94, %c0_24, %c0_25], %97 {strides = array<i32>} : memref<2x8x32xf32, #tpu.memory_space<vmem>>, vector<1x8x32xf32>,
    %c1_i32 = arith.constant 1 : i32
    %98 = arith.index_cast %c1_i32 : i32 to index
    %c0_26 = arith.constant 0 : index
    %c0_27 = arith.constant 0 : index
    %99 = vector.load %arg1[%98, %c0_26, %c0_27] : memref<2x8x128xf32, #tpu.memory_space<vmem>>, vector<1x8x128xf32>
    %100 = vector.shape_cast %99 : vector<1x8x128xf32> to vector<8x128xf32>
    %101 = vector.extract_strided_slice %100 {offsets = [0, 0], sizes = [2, 128], strides = [1, 1]} : vector<8x128xf32> to vector<2x128xf32>
    %cst_28 = arith.constant dense<0.000000e+00> : vector<2x128xf32>
    %102 = tpu.matmul %92, %3, %cst_28 {dimension_numbers = #tpu.dot_dimension_numbers<[1], [0], [0], [1], [0, 0, 1, 1], [], []>} : vector<2x32xf32>, vector<32x128xf32>, vector<2x128xf32> -> vector<2x128xf32>
    %103 = arith.addf %101, %102 : vector<2x128xf32>
    %104 = vector.extract_strided_slice %103 {offsets = [0, 0], sizes = [2, 96], strides = [1, 1]} : vector<2x128xf32> to vector<2x96xf32>
    %cst_29 = arith.constant 5.000000e-01 : f32
    %105 = vector.broadcast %cst_29 : f32 to vector<2x96xf32>
    %106 = arith.mulf %105, %104 : vector<2x96xf32>
    %107 = math.tanh %106 : vector<2x96xf32>
    %cst_30 = arith.constant 5.000000e-01 : f32
    %108 = vector.broadcast %cst_30 : f32 to vector<2x96xf32>
    %109 = arith.mulf %108, %107 : vector<2x96xf32>
    %cst_31 = arith.constant 5.000000e-01 : f32
    %110 = vector.broadcast %cst_31 : f32 to vector<2x96xf32>
    %111 = arith.addf %109, %110 : vector<2x96xf32>
    %112 = vector.extract_strided_slice %103 {offsets = [0, 96], sizes = [2, 32], strides = [1, 1]} : vector<2x128xf32> to vector<2x32xf32>
    %113 = math.tanh %112 : vector<2x32xf32>
    %114 = vector.extract_strided_slice %111 {offsets = [0, 0], sizes = [2, 32], strides = [1, 1]} : vector<2x96xf32> to vector<2x32xf32>
    %115 = vector.extract_strided_slice %111 {offsets = [0, 32], sizes = [2, 32], strides = [1, 1]} : vector<2x96xf32> to vector<2x32xf32>
    %116 = vector.extract_strided_slice %111 {offsets = [0, 64], sizes = [2, 32], strides = [1, 1]} : vector<2x96xf32> to vector<2x32xf32>
    %117 = arith.mulf %115, %90 : vector<2x32xf32>
    %118 = arith.mulf %114, %113 : vector<2x32xf32>
    %119 = arith.addf %117, %118 : vector<2x32xf32>
    %120 = math.tanh %119 : vector<2x32xf32>
    %121 = arith.mulf %116, %120 : vector<2x32xf32>
    %122 = vector.extract_strided_slice %100 {offsets = [2, 0], sizes = [2, 128], strides = [1, 1]} : vector<8x128xf32> to vector<2x128xf32>
    %cst_32 = arith.constant dense<0.000000e+00> : vector<2x128xf32>
    %123 = tpu.matmul %121, %3, %cst_32 {dimension_numbers = #tpu.dot_dimension_numbers<[1], [0], [0], [1], [0, 0, 1, 1], [], []>} : vector<2x32xf32>, vector<32x128xf32>, vector<2x128xf32> -> vector<2x128xf32>
    %124 = arith.addf %122, %123 : vector<2x128xf32>
    %125 = vector.extract_strided_slice %124 {offsets = [0, 0], sizes = [2, 96], strides = [1, 1]} : vector<2x128xf32> to vector<2x96xf32>
    %cst_33 = arith.constant 5.000000e-01 : f32
    %126 = vector.broadcast %cst_33 : f32 to vector<2x96xf32>
    %127 = arith.mulf %126, %125 : vector<2x96xf32>
    %128 = math.tanh %127 : vector<2x96xf32>
    %cst_34 = arith.constant 5.000000e-01 : f32
    %129 = vector.broadcast %cst_34 : f32 to vector<2x96xf32>
    %130 = arith.mulf %129, %128 : vector<2x96xf32>
    %cst_35 = arith.constant 5.000000e-01 : f32
    %131 = vector.broadcast %cst_35 : f32 to vector<2x96xf32>
    %132 = arith.addf %130, %131 : vector<2x96xf32>
    %133 = vector.extract_strided_slice %124 {offsets = [0, 96], sizes = [2, 32], strides = [1, 1]} : vector<2x128xf32> to vector<2x32xf32>
    %134 = math.tanh %133 : vector<2x32xf32>
    %135 = vector.extract_strided_slice %132 {offsets = [0, 0], sizes = [2, 32], strides = [1, 1]} : vector<2x96xf32> to vector<2x32xf32>
    %136 = vector.extract_strided_slice %132 {offsets = [0, 32], sizes = [2, 32], strides = [1, 1]} : vector<2x96xf32> to vector<2x32xf32>
    %137 = vector.extract_strided_slice %132 {offsets = [0, 64], sizes = [2, 32], strides = [1, 1]} : vector<2x96xf32> to vector<2x32xf32>
    %138 = arith.mulf %136, %119 : vector<2x32xf32>
    %139 = arith.mulf %135, %134 : vector<2x32xf32>
    %140 = arith.addf %138, %139 : vector<2x32xf32>
    %141 = math.tanh %140 : vector<2x32xf32>
    %142 = arith.mulf %137, %141 : vector<2x32xf32>
    %143 = vector.extract_strided_slice %100 {offsets = [4, 0], sizes = [2, 128], strides = [1, 1]} : vector<8x128xf32> to vector<2x128xf32>
    %cst_36 = arith.constant dense<0.000000e+00> : vector<2x128xf32>
    %144 = tpu.matmul %142, %3, %cst_36 {dimension_numbers = #tpu.dot_dimension_numbers<[1], [0], [0], [1], [0, 0, 1, 1], [], []>} : vector<2x32xf32>, vector<32x128xf32>, vector<2x128xf32> -> vector<2x128xf32>
    %145 = arith.addf %143, %144 : vector<2x128xf32>
    %146 = vector.extract_strided_slice %145 {offsets = [0, 0], sizes = [2, 96], strides = [1, 1]} : vector<2x128xf32> to vector<2x96xf32>
    %cst_37 = arith.constant 5.000000e-01 : f32
    %147 = vector.broadcast %cst_37 : f32 to vector<2x96xf32>
    %148 = arith.mulf %147, %146 : vector<2x96xf32>
    %149 = math.tanh %148 : vector<2x96xf32>
    %cst_38 = arith.constant 5.000000e-01 : f32
    %150 = vector.broadcast %cst_38 : f32 to vector<2x96xf32>
    %151 = arith.mulf %150, %149 : vector<2x96xf32>
    %cst_39 = arith.constant 5.000000e-01 : f32
    %152 = vector.broadcast %cst_39 : f32 to vector<2x96xf32>
    %153 = arith.addf %151, %152 : vector<2x96xf32>
    %154 = vector.extract_strided_slice %145 {offsets = [0, 96], sizes = [2, 32], strides = [1, 1]} : vector<2x128xf32> to vector<2x32xf32>
    %155 = math.tanh %154 : vector<2x32xf32>
    %156 = vector.extract_strided_slice %153 {offsets = [0, 0], sizes = [2, 32], strides = [1, 1]} : vector<2x96xf32> to vector<2x32xf32>
    %157 = vector.extract_strided_slice %153 {offsets = [0, 32], sizes = [2, 32], strides = [1, 1]} : vector<2x96xf32> to vector<2x32xf32>
    %158 = vector.extract_strided_slice %153 {offsets = [0, 64], sizes = [2, 32], strides = [1, 1]} : vector<2x96xf32> to vector<2x32xf32>
    %159 = arith.mulf %157, %140 : vector<2x32xf32>
    %160 = arith.mulf %156, %155 : vector<2x32xf32>
    %161 = arith.addf %159, %160 : vector<2x32xf32>
    %162 = math.tanh %161 : vector<2x32xf32>
    %163 = arith.mulf %158, %162 : vector<2x32xf32>
    %164 = vector.extract_strided_slice %100 {offsets = [6, 0], sizes = [2, 128], strides = [1, 1]} : vector<8x128xf32> to vector<2x128xf32>
    %cst_40 = arith.constant dense<0.000000e+00> : vector<2x128xf32>
    %165 = tpu.matmul %163, %3, %cst_40 {dimension_numbers = #tpu.dot_dimension_numbers<[1], [0], [0], [1], [0, 0, 1, 1], [], []>} : vector<2x32xf32>, vector<32x128xf32>, vector<2x128xf32> -> vector<2x128xf32>
    %166 = arith.addf %164, %165 : vector<2x128xf32>
    %167 = vector.extract_strided_slice %166 {offsets = [0, 0], sizes = [2, 96], strides = [1, 1]} : vector<2x128xf32> to vector<2x96xf32>
    %cst_41 = arith.constant 5.000000e-01 : f32
    %168 = vector.broadcast %cst_41 : f32 to vector<2x96xf32>
    %169 = arith.mulf %168, %167 : vector<2x96xf32>
    %170 = math.tanh %169 : vector<2x96xf32>
    %cst_42 = arith.constant 5.000000e-01 : f32
    %171 = vector.broadcast %cst_42 : f32 to vector<2x96xf32>
    %172 = arith.mulf %171, %170 : vector<2x96xf32>
    %cst_43 = arith.constant 5.000000e-01 : f32
    %173 = vector.broadcast %cst_43 : f32 to vector<2x96xf32>
    %174 = arith.addf %172, %173 : vector<2x96xf32>
    %175 = vector.extract_strided_slice %166 {offsets = [0, 96], sizes = [2, 32], strides = [1, 1]} : vector<2x128xf32> to vector<2x32xf32>
    %176 = math.tanh %175 : vector<2x32xf32>
    %177 = vector.extract_strided_slice %174 {offsets = [0, 0], sizes = [2, 32], strides = [1, 1]} : vector<2x96xf32> to vector<2x32xf32>
    %178 = vector.extract_strided_slice %174 {offsets = [0, 32], sizes = [2, 32], strides = [1, 1]} : vector<2x96xf32> to vector<2x32xf32>
    %179 = vector.extract_strided_slice %174 {offsets = [0, 64], sizes = [2, 32], strides = [1, 1]} : vector<2x96xf32> to vector<2x32xf32>
    %180 = arith.mulf %178, %161 : vector<2x32xf32>
    %181 = arith.mulf %177, %176 : vector<2x32xf32>
    %182 = arith.addf %180, %181 : vector<2x32xf32>
    %183 = math.tanh %182 : vector<2x32xf32>
    %184 = arith.mulf %179, %183 : vector<2x32xf32>
    %185 = tpu.concatenate %121, %142, %163, %184 in 0 : vector<2x32xf32>, vector<2x32xf32>, vector<2x32xf32>, vector<2x32xf32> -> vector<8x32xf32>
    %186 = arith.index_cast %c1_i32 : i32 to index
    %c0_44 = arith.constant 0 : index
    %c0_45 = arith.constant 0 : index
    %187 = vector.load %arg3[%186, %c0_44, %c0_45] : memref<2x8x32xf32, #tpu.memory_space<vmem>>, vector<1x8x32xf32>
    %188 = vector.shape_cast %187 : vector<1x8x32xf32> to vector<8x32xf32>
    %189 = vector.shape_cast %185 : vector<8x32xf32> to vector<1x8x32xf32>
    tpu.vector_store %arg3[%186, %c0_44, %c0_45], %189 {strides = array<i32>} : memref<2x8x32xf32, #tpu.memory_space<vmem>>, vector<1x8x32xf32>,
    %c2_i32 = arith.constant 2 : i32
    %c0_46 = arith.constant 0 : index
    %c0_47 = arith.constant 0 : index
    %190 = vector.load %arg4[%c0_46, %c0_47] : memref<2x32xf32, #tpu.memory_space<vmem>>, vector<2x32xf32>
    tpu.vector_store %arg4[%c0_46, %c0_47], %184 {strides = array<i32>} : memref<2x32xf32, #tpu.memory_space<vmem>>, vector<2x32xf32>,
    %c0_48 = arith.constant 0 : index
    %c0_49 = arith.constant 0 : index
    %191 = vector.load %arg5[%c0_48, %c0_49] : memref<2x32xf32, #tpu.memory_space<vmem>>, vector<2x32xf32>
    tpu.vector_store %arg5[%c0_48, %c0_49], %182 {strides = array<i32>} : memref<2x32xf32, #tpu.memory_space<vmem>>, vector<2x32xf32>,
    return
  }
  func.func @transform_0(%arg0: i32) -> (i32, i32, i32) {
    %c0_i32 = arith.constant 0 : i32
    %c0_i32_0 = arith.constant 0 : i32
    %c0_i32_1 = arith.constant 0 : i32
    return %arg0, %c0_i32, %c0_i32_0 : i32, i32, i32
  }
  func.func @transform_1(%arg0: i32) -> (i32, i32) {
    %c0_i32 = arith.constant 0 : i32
    %c0_i32_0 = arith.constant 0 : i32
    %c0_i32_1 = arith.constant 0 : i32
    return %c0_i32, %c0_i32_0 : i32, i32
  }
  func.func @transform_2(%arg0: i32) -> (i32, i32, i32) {
    %c0_i32 = arith.constant 0 : i32
    %c0_i32_0 = arith.constant 0 : i32
    %c0_i32_1 = arith.constant 0 : i32
    return %arg0, %c0_i32, %c0_i32_0 : i32, i32, i32
  }
  func.func @transform_3(%arg0: i32) -> (i32, i32) {
    %c0_i32 = arith.constant 0 : i32
    %c0_i32_0 = arith.constant 0 : i32
    %c0_i32_1 = arith.constant 0 : i32
    return %c0_i32, %c0_i32_0 : i32, i32
  }
  func.func @transform_4(%arg0: i32) -> (i32, i32) {
    %c0_i32 = arith.constant 0 : i32
    %c0_i32_0 = arith.constant 0 : i32
    %c0_i32_1 = arith.constant 0 : i32
    return %c0_i32, %c0_i32_0 : i32, i32
  }
}

</mosaic_0001>

<bundles_post_ra>
// kernel: char_lstm_generator.1
= control target key start
LH: loop header
LB: loop body
LE: loop exit
PB: predicated region body
PF: predicated region fallthrough
CT: control target
= control target key end

     0   :  { %10 = vsyncpa [#allocation3], 0  ;;  %vm20_vm0 = vcmask 254976   ;;  %v1163_v1 = vmov 0.0   ;;  %vm1164_vm1 = vmmov 0   ;;  %s1391_s0 = inlined_call_operand.vmem [shape: f32[2,8,128], index: 0, kind: input, shape index: {}]   ;;  %s1392_s1 = inlined_call_operand.vmem [shape: f32[32,128], index: 1, kind: input, shape index: {}]   ;;  %s1393_s2 = inlined_call_operand.vmem [shape: f32[2,8,32], index: 2, kind: output, shape index: {0}]   ;;  %s1394_s3 = inlined_call_operand.hbm [shape: f32[2,32], index: 3, kind: output, shape index: {1}]   ;;  %s1395_s4 = inlined_call_operand.hbm [shape: f32[2,32], index: 4, kind: output, shape index: {2}]  }
   0x1   :  { %v1198_v0 = vld [vmem:[%s1392_s1 + $0x18] sm:$0xff]  ;;  %976 = vmatprep.subr.mxu0 %v1163_v1  ;;  %v1204_v2 = vld [vmem:[%s1392_s1 + $0x10] sm:$0xff]  ;;  %984 = vmatprep.mubr.msk.f32.mxu0 %vm1164_vm1, %v1163_v1  ;;  %21 = vst.msk [vmem:[#allocation2] sm:$0x3] %vm20_vm0, %v1163_v1  ;;  %22 = vst.msk [vmem:[#allocation4] sm:$0x3] %vm20_vm0, %v1163_v1 }
   0x2   :  { %11 = vsyncpa [#allocation5], 0  ;;  %977 = vmatpush3.msra.mxu0 %v1198_v0  ;;  %987 = vmatprep.subr.mxu1 %v1163_v1  ;;  %v1216_v3 = vld [vmem:[%s1392_s1 + $0x8] sm:$0xff]  ;;  %v1225_v4 = vld [vmem:[%s1392_s1] sm:$0xff]  ;;  %vm30_vm2 = vcmask 261120   ;;  %s1165_s24 = smov 32  }
   0x3   :  { %978 = vmatprep.subr.mxu0 %v1163_v1  ;;  %988 = vmatpush3.msra.mxu1 %v1198_v0  ;;  %v1253_v6 = vld [vmem:[%s1391_s0] sm:$0xff]  ;;  %s1166_s25 = smov 64   ;;  %vm445_vm3 = vcmask 1041408   ;;  %vm447_vm4 = vcmask 1043456   ;;  %vm449_vm5 = vcmask 1045504   ;;  %s1168_s28 = smov [#allocation4]  }
   0x4   :  { %979 = vmatpush3.msra.mxu0 %v1204_v2  ;;  %989 = vmatprep.subr.mxu1 %v1163_v1  ;;  %s912_s29 = sshll.u32 %s1168_s28, 4  ;;  %vm887_vm6 = vcmask 261126   ;;  %s913_s29 = int_to_ptr.vmem [resolvable:$true] %s912_s29 }
   0x5   :  { %980 = vmatprep.subr.mxu0 %v1163_v1  ;;  %990 = vmatpush3.msra.mxu1 %v1204_v2  ;;  %s1119_s30 = scalar_lea.vmem %s913_s29, 32  ;;  %p1124_p1 = scmp.lt.s32.totalorder %s913_s29, %s913_s29 }
   0x6   :  { %981 = vmatpush3.msra.mxu0 %v1216_v3  ;;  %991 = vmatprep.subr.mxu1 %v1163_v1  ;;  %p1120_p0 = scmp.ne.s32.totalorder %s913_s29, %s1119_s30  ;;  %p1125_p2 = scmp.lt.s32.totalorder %s1119_s30, %s1119_s30 }
   0x7   :  { %982 = vmatprep.subr.mxu0 %v1163_v1  ;;  %992 = vmatpush3.msra.mxu1 %v1216_v3 }
   0x8   :  { %983 = vmatpush3.msra.mxu0 %v1225_v4  ;;  %v27_v5 = vld [vmem:[#allocation2] sm:$0x3]  ;;  %993 = vmatprep.subr.mxu1 %v1163_v1  ;;  %v28_v11 = vld [vmem:[#allocation4] sm:$0x3]  ;;  %p1126_p3 = por %p1125_p2, %p1124_p1 }
   0x9   :  { %985 = vmatmul.mubr.msk.f32.vlgmr.msra.gmra.mxu0 %vm30_vm2, %v27_v5  ;;  %994 = vmatpush3.msra.mxu1 %v1225_v4 }
   0xa   :  { %995 = vmatprep.mubr.msk.f32.mxu1 %vm1164_vm1, %v1163_v1  ;;  %998 = vmatprep.subr.mxu0 %v1163_v1  ;;  %p1127_p4 = pnand %p1126_p3, %p1120_p0 }
   0xb   :  { %999 = vmatpush3.msra.mxu0 %v1198_v0  ;;  %1006 = vmatprep.mubr.msk.f32.mxu0 %vm1164_vm1, %v1163_v1 }
   0xc   :  { %1000 = vmatprep.subr.mxu0 %v1163_v1  ;;  %1009 = vmatprep.subr.mxu1 %v1163_v1 }
   0xd   :  { %1001 = vmatpush3.msra.mxu0 %v1204_v2 }
   0xe   :  { %1002 = vmatprep.subr.mxu0 %v1163_v1 }
   0xf   :  { %1003 = vmatpush3.msra.mxu0 %v1216_v3 }
  0x10   :  { %1004 = vmatprep.subr.mxu0 %v1163_v1 }
  0x11   :  { %1005 = vmatpush3.msra.mxu0 %v1225_v4 }
  0x12   :  { %1020 = vmatprep.subr.mxu0 %v1163_v1 }
  0xc9   :  { %v100_v7 = vpop.f32.mrf.mxu0 }
  0xca   :  { %v104_v8 = vadd.f32 %v100_v7, %v1253_v6 }
  0xcb   :  { %v986_v9 = vpop.f32.mrf.mxu0 }
  0xcc   :  { %1071 = vtanh.f32 %v104_v8  ;;  %v105_v12 = vmul.f32 0.5, %v104_v8 }
  0xce   :  { %1073 = vtanh.f32 %v105_v12 }
  0xd9   :  { %v1072_v10 = vpop.eup %1071 }
  0xda   :  { %116 = vrot.lane.b32.xlu0 %v1072_v10, %s1165_s24 }
  0xdb   :  { %v1074_v13 = vpop.eup %1073 }
  0xdc   :  { %v107_v14 = vmul.f32 0.5, %v1074_v13 }
  0xde   :  { %111 = vrot.lane.b32.xlu0 %v28_v11, %s1165_s24  ;;  %v108_v15 = vadd.f32 0.5, %v107_v14 }
 0x14c   :  { %v117_v16 = vpop.permute.xlu0 %116 }
 0x14d   :  { %v119_v17 = vmul.f32 %v117_v16, %v108_v15 }
 0x14f   :  { %121 = vrot.lane.b32.xlu1 %v119_v17, %s1165_s24 }
 0x150   :  { %v112_v18 = vpop.permute.xlu0 %111 }
 0x151   :  { %v114_v19 = vmul.f32 %v112_v18, %v108_v15 }
 0x1c1   :  { %v122_v20 = vpop.permute.xlu1 %121 }
 0x1c2   :  { %v124_v21 = vadd.f32 %v122_v20, %v114_v19 }
 0x1c4   :  { %1075 = vtanh.f32 %v124_v21  ;;  %v216_v37 = vrot.slane %v124_v21, 6 }
 0x1d1   :  { %v1076_v22 = vpop.eup %1075 }
 0x1d2   :  { %127 = vrot.lane.b32.xlu1 %v1076_v22, %s1165_s24 }
 0x244   :  { %v128_v23 = vpop.permute.xlu1 %127 }
 0x245   :  { %v1260_v24 = vmul.f32 %v128_v23, %v108_v15 }
 0x247   :  { %132 = vrot.lane.b32.xlu0 %v1260_v24, %s1166_s25 }
 0x2b9   :  { %v133_v25 = vpop.permute.xlu0 %132 }
 0x2ba   :  { %996 = vmatmul.mubr.msk.f32.vlgmr.msra.gmra.mxu1 %vm30_vm2, %v133_v25 }
 0x2bb   :  { %1010 = vmatpush3.msra.mxu1 %v1198_v0  ;;  %1017 = vmatprep.mubr.msk.f32.mxu1 %vm1164_vm1, %v1163_v1 }
 0x2bc   :  { %1011 = vmatprep.subr.mxu1 %v1163_v1 }
 0x2bd   :  { %1012 = vmatpush3.msra.mxu1 %v1204_v2 }
 0x2be   :  { %1013 = vmatprep.subr.mxu1 %v1163_v1 }
 0x2bf   :  { %1014 = vmatpush3.msra.mxu1 %v1216_v3 }
 0x2c0   :  { %1015 = vmatprep.subr.mxu1 %v1163_v1 }
 0x2c1   :  { %1016 = vmatpush3.msra.mxu1 %v1225_v4 }
 0x2c2   :  { %1031 = vmatprep.subr.mxu1 %v1163_v1 }
 0x37a   :  { %v202_v26 = vpop.f32.mrf.mxu1 }
 0x37b   :  { %v207_v27 = vrot.slane %v202_v26, 6 }
 0x37c   :  { %v997_v28 = vpop.f32.mrf.mxu1 }
 0x37d   :  { %v209_v29 = vadd.f32 %v207_v27, %v1253_v6 }
 0x37f   :  { %1077 = vtanh.f32 %v209_v29  ;;  %v210_v31 = vmul.f32 0.5, %v209_v29 }
 0x381   :  { %1079 = vtanh.f32 %v210_v31 }
 0x38c   :  { %v1078_v30 = vpop.eup %1077 }
 0x38d   :  { %220 = vrot.lane.b32.xlu1 %v1078_v30, %s1165_s24  ;;  %v1331_v30 = vld [vmem:[%s1391_s0 + $0x8] sm:$0xff]  ;;  %s1167_s0 = smov 96  }
 0x38e   :  { %v1080_v32 = vpop.eup %1079 }
 0x38f   :  { %v212_v33 = vmul.f32 0.5, %v1080_v32 }
 0x391   :  { %v213_v34 = vadd.f32 0.5, %v212_v33 }
 0x393   :  { %v218_v38 = vmul.f32 %v216_v37, %v213_v34 }
 0x3ff   :  { %v221_v35 = vpop.permute.xlu1 %220 }
 0x400   :  { %v223_v36 = vmul.f32 %v221_v35, %v213_v34 }
 0x402   :  { %225 = vrot.lane.b32.xlu0 %v223_v36, %s1165_s24 }
 0x474   :  { %v226_v39 = vpop.permute.xlu0 %225 }
 0x475   :  { %v228_v40 = vadd.f32 %v226_v39, %v218_v38 }
 0x477   :  { %1081 = vtanh.f32 %v228_v40  ;;  %v321_v57 = vrot.slane %v228_v40, 6 }
 0x484   :  { %v1082_v41 = vpop.eup %1081 }
 0x485   :  { %231 = vrot.lane.b32.xlu1 %v1082_v41, %s1165_s24 }
 0x4f7   :  { %v232_v42 = vpop.permute.xlu1 %231 }
 0x4f8   :  { %v234_v43 = vmul.f32 %v232_v42, %v213_v34 }
 0x4fa   :  { %v236_v44 = vrot.slane %v234_v43, 2  ;;  %v446_v5 = vsel %vm445_vm3, %v1260_v24, %v234_v43 }
 0x4fc   :  { %237 = vrot.lane.b32.xlu0 %v236_v44, %s1166_s25 }
 0x56e   :  { %v238_v45 = vpop.permute.xlu0 %237 }
 0x56f   :  { %1007 = vmatmul.mubr.msk.f32.vlgmr.msra.gmra.mxu0 %vm30_vm2, %v238_v45 }
 0x570   :  { %1021 = vmatpush3.msra.mxu0 %v1198_v0  ;;  %1028 = vmatprep.mubr.msk.f32.mxu0 %vm1164_vm1, %v1163_v1 }
 0x571   :  { %1022 = vmatprep.subr.mxu0 %v1163_v1 }
 0x572   :  { %1023 = vmatpush3.msra.mxu0 %v1204_v2 }
 0x573   :  { %1024 = vmatprep.subr.mxu0 %v1163_v1 }
 0x574   :  { %1025 = vmatpush3.msra.mxu0 %v1216_v3 }
 0x575   :  { %1026 = vmatprep.subr.mxu0 %v1163_v1 }
 0x576   :  { %1027 = vmatpush3.msra.mxu0 %v1225_v4 }
 0x577   :  { %1042 = vmatprep.subr.mxu0 %v1163_v1 }
 0x62f   :  { %v307_v46 = vpop.f32.mrf.mxu0 }
 0x630   :  { %v312_v47 = vrot.slane %v307_v46, 4 }
 0x631   :  { %v1008_v48 = vpop.f32.mrf.mxu0 }
 0x632   :  { %v314_v49 = vadd.f32 %v312_v47, %v1253_v6 }
 0x634   :  { %1083 = vtanh.f32 %v314_v49  ;;  %v315_v51 = vmul.f32 0.5, %v314_v49 }
 0x636   :  { %1085 = vtanh.f32 %v315_v51 }
 0x641   :  { %v1084_v50 = vpop.eup %1083 }
 0x642   :  { %325 = vrot.lane.b32.xlu1 %v1084_v50, %s1165_s24 }
 0x643   :  { %v1086_v52 = vpop.eup %1085 }
 0x644   :  { %v317_v53 = vmul.f32 0.5, %v1086_v52 }
 0x646   :  { %v318_v54 = vadd.f32 0.5, %v317_v53 }
 0x648   :  { %v323_v58 = vmul.f32 %v321_v57, %v318_v54 }
 0x6b4   :  { %v326_v55 = vpop.permute.xlu1 %325 }
 0x6b5   :  { %v328_v56 = vmul.f32 %v326_v55, %v318_v54 }
 0x6b7   :  { %330 = vrot.lane.b32.xlu0 %v328_v56, %s1165_s24 }
 0x729   :  { %v331_v59 = vpop.permute.xlu0 %330 }
 0x72a   :  { %v333_v60 = vadd.f32 %v331_v59, %v323_v58 }
 0x72c   :  { %1087 = vtanh.f32 %v333_v60  ;;  %v426_v21 = vrot.slane %v333_v60, 6 }
 0x739   :  { %v1088_v61 = vpop.eup %1087 }
 0x73a   :  { %336 = vrot.lane.b32.xlu1 %v1088_v61, %s1165_s24 }
 0x7ac   :  { %v337_v62 = vpop.permute.xlu1 %336 }
 0x7ad   :  { %v339_v63 = vmul.f32 %v337_v62, %v318_v54 }
 0x7af   :  { %v341_v7 = vrot.slane %v339_v63, 4  ;;  %v448_v8 = vsel %vm447_vm4, %v446_v5, %v339_v63 }
 0x7b1   :  { %342 = vrot.lane.b32.xlu0 %v341_v7, %s1166_s25 }
 0x823   :  { %v343_v9 = vpop.permute.xlu0 %342 }
 0x824   :  { %1018 = vmatmul.mubr.msk.f32.vlgmr.msra.gmra.mxu1 %vm30_vm2, %v343_v9 }
 0x825   :  { %1032 = vmatpush3.msra.mxu1 %v1198_v0  ;;  %1039 = vmatprep.mubr.msk.f32.mxu1 %vm1164_vm1, %v1163_v1 }
 0x826   :  { %1033 = vmatprep.subr.mxu1 %v1163_v1 }
 0x827   :  { %1034 = vmatpush3.msra.mxu1 %v1204_v2 }
 0x828   :  { %1035 = vmatprep.subr.mxu1 %v1163_v1 }
 0x829   :  { %1036 = vmatpush3.msra.mxu1 %v1216_v3 }
 0x82a   :  { %1037 = vmatprep.subr.mxu1 %v1163_v1 }
 0x82b   :  { %1038 = vmatpush3.msra.mxu1 %v1225_v4 }
 0x82c   :  { %1053 = vmatprep.subr.mxu1 %v1163_v1 }
 0x8e4   :  { %v412_v10 = vpop.f32.mrf.mxu1 }
 0x8e5   :  { %v417_v11 = vrot.slane %v412_v10, 2 }
 0x8e6   :  { %v1019_v12 = vpop.f32.mrf.mxu1 }
 0x8e7   :  { %v419_v13 = vadd.f32 %v417_v11, %v1253_v6 }
 0x8e9   :  { %1089 = vtanh.f32 %v419_v13  ;;  %v420_v15 = vmul.f32 0.5, %v419_v13 }
 0x8eb   :  { %1091 = vtanh.f32 %v420_v15 }
 0x8f6   :  { %v1090_v14 = vpop.eup %1089 }
 0x8f7   :  { %430 = vrot.lane.b32.xlu1 %v1090_v14, %s1165_s24 }
 0x8f8   :  { %v1092_v16 = vpop.eup %1091 }
 0x8f9   :  { %v422_v17 = vmul.f32 0.5, %v1092_v16 }
 0x8fb   :  { %v423_v18 = vadd.f32 0.5, %v422_v17 }
 0x8fd   :  { %v428_v22 = vmul.f32 %v426_v21, %v423_v18 }
 0x969   :  { %v431_v19 = vpop.permute.xlu1 %430 }
 0x96a   :  { %v433_v20 = vmul.f32 %v431_v19, %v423_v18 }
 0x96c   :  { %435 = vrot.lane.b32.xlu0 %v433_v20, %s1165_s24 }
 0x9de   :  { %v436_v23 = vpop.permute.xlu0 %435 }
 0x9df   :  { %v438_v24 = vadd.f32 %v436_v23, %v428_v22 }
 0x9e1   :  { %1093 = vtanh.f32 %v438_v24  ;;  %v541_v41 = vrot.slane %v438_v24, 6 }
 0x9ee   :  { %v1094_v25 = vpop.eup %1093 }
 0x9ef   :  { %441 = vrot.lane.b32.xlu1 %v1094_v25, %s1165_s24 }
 0xa61   :  { %v442_v6 = vpop.permute.xlu1 %441 }
 0xa62   :  { %v444_v26 = vmul.f32 %v442_v6, %v423_v18 }
 0xa64   :  { %v459_v27 = vrot.slane %v444_v26, 6  ;;  %v1315_v28 = vsel %vm449_vm5, %v448_v8, %v444_v26 }
 0xa66   :  { %460 = vrot.lane.b32.xlu0 %v459_v27, %s1166_s25 }
 0xad8   :  { %v461_v29 = vpop.permute.xlu0 %460 }
 0xad9   :  { %1029 = vmatmul.mubr.msk.f32.vlgmr.msra.gmra.mxu0 %vm30_vm2, %v461_v29 }
 0xada   :  { %1043 = vmatpush3.msra.mxu0 %v1198_v0  ;;  %1050 = vmatprep.mubr.msk.f32.mxu0 %vm1164_vm1, %v1163_v1 }
 0xadb   :  { %1044 = vmatprep.subr.mxu0 %v1163_v1 }
 0xadc   :  { %1045 = vmatpush3.msra.mxu0 %v1204_v2 }
 0xadd   :  { %1046 = vmatprep.subr.mxu0 %v1163_v1 }
 0xade   :  { %1047 = vmatpush3.msra.mxu0 %v1216_v3 }
 0xadf   :  { %1048 = vmatprep.subr.mxu0 %v1163_v1 }
 0xae0   :  { %1049 = vmatpush3.msra.mxu0 %v1225_v4 }
 0xb99   :  { %v530_v31 = vpop.f32.mrf.mxu0 }
 0xb9a   :  { %v534_v32 = vadd.f32 %v1331_v30, %v530_v31 }
 0xb9b   :  { %v1030_v33 = vpop.f32.mrf.mxu0 }
 0xb9c   :  { %1095 = vtanh.f32 %v534_v32  ;;  %v535_v35 = vmul.f32 0.5, %v534_v32 }
 0xb9e   :  { %1097 = vtanh.f32 %v535_v35 }
 0xba9   :  { %v1096_v34 = vpop.eup %1095 }
 0xbaa   :  { %545 = vrot.lane.b32.xlu1 %v1096_v34, %s1165_s24 }
 0xbab   :  { %v1098_v36 = vpop.eup %1097 }
 0xbac   :  { %v537_v37 = vmul.f32 0.5, %v1098_v36 }
 0xbae   :  { %v538_v38 = vadd.f32 0.5, %v537_v37 }
 0xbb0   :  { %v543_v42 = vmul.f32 %v541_v41, %v538_v38 }
 0xc1c   :  { %v546_v39 = vpop.permute.xlu1 %545 }
 0xc1d   :  { %v548_v40 = vmul.f32 %v546_v39, %v538_v38 }
 0xc1f   :  { %550 = vrot.lane.b32.xlu0 %v548_v40, %s1165_s24 }
 0xc91   :  { %v551_v43 = vpop.permute.xlu0 %550 }
 0xc92   :  { %v553_v44 = vadd.f32 %v551_v43, %v543_v42 }
 0xc94   :  { %1099 = vtanh.f32 %v553_v44 }
 0xca1   :  { %v1100_v45 = vpop.eup %1099 }
 0xca2   :  { %556 = vrot.lane.b32.xlu1 %v1100_v45, %s1165_s24 }
 0xd14   :  { %v557_v46 = vpop.permute.xlu1 %556 }
 0xd15   :  { %v1337_v47 = vmul.f32 %v557_v46, %v538_v38 }
 0xd17   :  { %561 = vrot.lane.b32.xlu0 %v1337_v47, %s1166_s25 }
 0xd89   :  { %v562_v48 = vpop.permute.xlu0 %561 }
 0xd8a   :  { %1040 = vmatmul.mubr.msk.f32.vlgmr.msra.gmra.mxu1 %vm30_vm2, %v562_v48 }
 0xd8b   :  { %1054 = vmatpush3.msra.mxu1 %v1198_v0  ;;  %1061 = vmatprep.mubr.msk.f32.mxu1 %vm1164_vm1, %v1163_v1 }
 0xd8c   :  { %1055 = vmatprep.subr.mxu1 %v1163_v1 }
 0xd8d   :  { %1056 = vmatpush3.msra.mxu1 %v1204_v2 }
 0xd8e   :  { %1057 = vmatprep.subr.mxu1 %v1163_v1 }
 0xd8f   :  { %1058 = vmatpush3.msra.mxu1 %v1216_v3 }
 0xd90   :  { %1059 = vmatprep.subr.mxu1 %v1163_v1  ;;  %v645_v1 = vrot.slane %v553_v44, 6 }
 0xd91   :  { %1060 = vmatpush3.msra.mxu1 %v1225_v4 }
 0xe4a   :  { %v631_v49 = vpop.f32.mrf.mxu1 }
 0xe4b   :  { %v636_v50 = vrot.slane %v631_v49, 6 }
 0xe4c   :  { %v1041_v51 = vpop.f32.mrf.mxu1 }
 0xe4d   :  { %v638_v0 = vadd.f32 %v1331_v30, %v636_v50 }
 0xe4f   :  { %1101 = vtanh.f32 %v638_v0  ;;  %v639_v53 = vmul.f32 0.5, %v638_v0 }
 0xe51   :  { %1103 = vtanh.f32 %v639_v53 }
 0xe5c   :  { %v1102_v52 = vpop.eup %1101 }
 0xe5d   :  { %649 = vrot.lane.b32.xlu1 %v1102_v52, %s1165_s24 }
 0xe5e   :  { %v1104_v2 = vpop.eup %1103 }
 0xe5f   :  { %v641_v54 = vmul.f32 0.5, %v1104_v2 }
 0xe61   :  { %v642_v55 = vadd.f32 0.5, %v641_v54 }
 0xe63   :  { %v647_v4 = vmul.f32 %v645_v1, %v642_v55 }
 0xecf   :  { %v650_v56 = vpop.permute.xlu1 %649 }
 0xed0   :  { %v652_v3 = vmul.f32 %v650_v56, %v642_v55 }
 0xed2   :  { %654 = vrot.lane.b32.xlu0 %v652_v3, %s1165_s24 }
 0xf44   :  { %v655_v57 = vpop.permute.xlu0 %654 }
 0xf45   :  { %v657_v58 = vadd.f32 %v655_v57, %v647_v4 }
 0xf47   :  { %1105 = vtanh.f32 %v657_v58  ;;  %v750_v17 = vrot.slane %v657_v58, 6 }
 0xf54   :  { %v1106_v59 = vpop.eup %1105 }
 0xf55   :  { %660 = vrot.lane.b32.xlu1 %v1106_v59, %s1165_s24 }
 0xfc7   :  { %v661_v60 = vpop.permute.xlu1 %660 }
 0xfc8   :  { %v663_v61 = vmul.f32 %v661_v60, %v642_v55 }
 0xfca   :  { %v665_v62 = vrot.slane %v663_v61, 2  ;;  %v874_v24 = vsel %vm445_vm3, %v1337_v47, %v663_v61 }
 0xfcc   :  { %666 = vrot.lane.b32.xlu0 %v665_v62, %s1166_s25 }
0x103e   :  { %v667_v63 = vpop.permute.xlu0 %666 }
0x103f   :  { %1051 = vmatmul.mubr.msk.f32.vlgmr.msra.gmra.mxu0 %vm30_vm2, %v667_v63 }
0x10ff   :  { %v736_v5 = vpop.f32.mrf.mxu0 }
0x1100   :  { %v741_v7 = vrot.slane %v736_v5, 4 }
0x1101   :  { %v1052_v8 = vpop.f32.mrf.mxu0 }
0x1102   :  { %v743_v9 = vadd.f32 %v1331_v30, %v741_v7 }
0x1104   :  { %1107 = vtanh.f32 %v743_v9  ;;  %v744_v11 = vmul.f32 0.5, %v743_v9 }
0x1106   :  { %1109 = vtanh.f32 %v744_v11 }
0x1111   :  { %v1108_v10 = vpop.eup %1107 }
0x1112   :  { %754 = vrot.lane.b32.xlu1 %v1108_v10, %s1165_s24 }
0x1113   :  { %v1110_v12 = vpop.eup %1109 }
0x1114   :  { %v746_v13 = vmul.f32 0.5, %v1110_v12 }
0x1116   :  { %v747_v14 = vadd.f32 0.5, %v746_v13 }
0x1118   :  { %v752_v18 = vmul.f32 %v750_v17, %v747_v14 }
0x1184   :  { %v755_v15 = vpop.permute.xlu1 %754 }
0x1185   :  { %v757_v16 = vmul.f32 %v755_v15, %v747_v14 }
0x1187   :  { %759 = vrot.lane.b32.xlu0 %v757_v16, %s1165_s24 }
0x11f9   :  { %v760_v19 = vpop.permute.xlu0 %759 }
0x11fa   :  { %v762_v20 = vadd.f32 %v760_v19, %v752_v18 }
0x11fc   :  { %1111 = vtanh.f32 %v762_v20  ;;  %v855_v40 = vrot.slane %v762_v20, 6 }
0x1209   :  { %v1112_v21 = vpop.eup %1111 }
0x120a   :  { %765 = vrot.lane.b32.xlu1 %v1112_v21, %s1165_s24 }
0x127c   :  { %v766_v22 = vpop.permute.xlu1 %765 }
0x127d   :  { %v768_v23 = vmul.f32 %v766_v22, %v747_v14 }
0x127f   :  { %v770_v25 = vrot.slane %v768_v23, 4  ;;  %v875_v6 = vsel %vm447_vm4, %v874_v24, %v768_v23 }
0x1281   :  { %771 = vrot.lane.b32.xlu0 %v770_v25, %s1166_s25 }
0x12f3   :  { %v772_v26 = vpop.permute.xlu0 %771 }
0x12f4   :  { %1062 = vmatmul.mubr.msk.f32.vlgmr.msra.gmra.mxu1 %vm30_vm2, %v772_v26 }
0x13b4   :  { %v841_v27 = vpop.f32.mrf.mxu1 }
0x13b5   :  { %v846_v29 = vrot.slane %v841_v27, 2 }
0x13b6   :  { %v1063_v31 = vpop.f32.mrf.mxu1 }
0x13b7   :  { %v848_v32 = vadd.f32 %v1331_v30, %v846_v29 }
0x13b9   :  { %1113 = vtanh.f32 %v848_v32  ;;  %v849_v34 = vmul.f32 0.5, %v848_v32 }
0x13bb   :  { %1115 = vtanh.f32 %v849_v34 }
0x13c6   :  { %v1114_v33 = vpop.eup %1113 }
0x13c7   :  { %859 = vrot.lane.b32.xlu1 %v1114_v33, %s1165_s24 }
0x13c8   :  { %v1116_v35 = vpop.eup %1115 }
0x13c9   :  { %v851_v36 = vmul.f32 0.5, %v1116_v35 }
0x13cb   :  { %v852_v37 = vadd.f32 0.5, %v851_v36 }
0x13cd   :  { %v857_v41 = vmul.f32 %v855_v40, %v852_v37 }
0x1439   :  { %v860_v38 = vpop.permute.xlu1 %859 }
0x143a   :  { %v862_v39 = vmul.f32 %v860_v38, %v852_v37 }
0x143c   :  { %864 = vrot.lane.b32.xlu0 %v862_v39, %s1165_s24 }
0x14ae   :  { %v865_v42 = vpop.permute.xlu0 %864 }
0x14af   :  { %v867_v43 = vadd.f32 %v865_v42, %v857_v41 }
0x14b1   :  { %1117 = vtanh.f32 %v867_v43 }
0x14be   :  { %v1118_v44 = vpop.eup %1117 }
0x14bf   :  { %870 = vrot.lane.b32.xlu1 %v1118_v44, %s1165_s24 }
0x14c3   :  { %890 = vrot.lane.b32.xlu1 %v867_v43, %s1167_s0 }
0x1531   :  { %v871_v30 = vpop.permute.xlu1 %870 }
0x1532   :  { %v873_v45 = vmul.f32 %v871_v30, %v852_v37 }
0x1534   :  { %884 = vrot.lane.b32.xlu0 %v873_v45, %s1166_s25  ;;  %v876_v46 = vsel %vm449_vm5, %v875_v6, %v873_v45 }
0x1535   :  { %878 = vrot.lane.b32.xlu1 %v876_v46, %s1166_s25  ;;  %v891_v47 = vpop.permute.xlu1 %890 }
0x1536   :  { %893 = vst.msk [vmem:[#allocation4 - $0x6] sm:$0xc0] %vm887_vm6, %v891_v47 }
0x1537   :  { %1130 = shalt.err (!%p1127_p4)
}
0x1538   :  { %915 = dma.vmem_to_hbm [thread:$0]  %s913_s29, 32, %s1395_s4, [#allocation5]   ;;  %452 = vrot.lane.b32.xlu0 %v1315_v28, %s1166_s25 }
0x1539   :  { %s1169_s7 = smov [#allocation2]  }
0x153a   :  { %s902_s8 = sshll.u32 %s1169_s7, 4  ;;  %s903_s8 = int_to_ptr.vmem [resolvable:$true] %s902_s8 }
0x153b   :  { %s1139_s11 = scalar_lea.vmem %s903_s8, 32  ;;  %p1144_p6 = scmp.lt.s32.totalorder %s903_s8, %s903_s8 }
0x153c   :  { %p1140_p5 = scmp.ne.s32.totalorder %s903_s8, %s1139_s11  ;;  %p1145_p7 = scmp.lt.s32.totalorder %s1139_s11, %s1139_s11 }
0x153e   :  { %p1146_p8 = por %p1145_p7, %p1144_p6 }
0x1540   :  { %p1147_p9 = pnand %p1146_p8, %p1140_p5 }
0x15a6   :  { %v885_v48 = vpop.permute.xlu0 %884 }
0x15a7   :  { %v879_v49 = vpop.permute.xlu1 %878  ;;  %888 = vst.msk [vmem:[#allocation2 - $0x6] sm:$0xc0] %vm887_vm6, %v885_v48 }
0x15a8   :  { %935 = vst.msk [vmem:[%s1393_s2 + $0x8] sm:$0xff] %vm30_vm2, %v879_v49 }
0x15a9   :  { %1150 = shalt.err (!%p1147_p9)
}
0x15aa   :  { %905 = dma.vmem_to_hbm [thread:$0]  %s903_s8, 32, %s1394_s3, [#allocation3]   ;;  %v453_v28 = vpop.permute.xlu0 %452 }
0x15ab   :  { %455 = vst.msk [vmem:[%s1393_s2] sm:$0xff] %vm30_vm2, %v453_v28 }
0x15ac   :  { %1159 = dma.done.wait [#allocation3], 32  }
0x15ad   :  { %1160 = vsyncadd [#allocation3], 4294967264 }
0x15ae   :  { %1161 = dma.done.wait [#allocation5], 32  }
0x15af   :  { %1162 = vsyncadd [#allocation5], 4294967264 }
0x15b0   :  { %924 = vsyncpa [#allocation3], 1 }
0x15b1   :  { %925 = vsyncpa [#allocation5], 1 }

</bundles_post_ra>
